<compile_context>
chip_gen: v7x
topology: tpu7x:2x2x1
jax: 0.10.0
libtpu: 0.0.40
codegen_flags: <defaults>
</compile_context>

<pallas_src>
import functools

import jax
import jax.numpy as jnp
from jax.experimental import pallas as pl
from jax.experimental.pallas import tpu as pltpu

CPAD = 8     # all channel counts in this decoder are <= 8 -> one sublane tile
LANE = 128   # TPU lane width


def _round_up(x, m):
    return (x + m - 1) // m * m


# --------------------------------------------------------------------------
# pltpu.roll direction probe (resolved once, eagerly, on the TPU).
# --------------------------------------------------------------------------
_ROLL_SIGN = None


def _roll_semantics_sign():
    """+1 if pltpu.roll matches jnp.roll (out[i] = x[i - shift]), else -1."""
    global _ROLL_SIGN
    if _ROLL_SIGN is None:
        def _probe(x_ref, o_ref):
            o_ref[...] = pltpu.roll(x_ref[...], 1, axis=1)

        x = jnp.tile(jnp.arange(LANE, dtype=jnp.float32)[None, :], (CPAD, 1))
        y = pl.pallas_call(
            _probe,
            out_shape=jax.ShapeDtypeStruct((CPAD, LANE), jnp.float32))(x)
        v = float(jax.device_get(y)[0, 0])
        _ROLL_SIGN = 1 if v > (LANE // 2) else -1
    return _ROLL_SIGN


def _lane_shift(s, mp):
    """Rotation amount so that rolled[:, m] == x[:, m + s] (no wrap needed
    for interior positions by construction of the padded layout)."""
    return (-s) % mp if _roll_semantics_sign() > 0 else s % mp


# --------------------------------------------------------------------------
# Padded CHW-flat ("PCF") layout helpers.
# A feature map (N, C, H, W) is stored as (N, 8, Mp) f32 where the last axis
# is the flattened zero-padded spatial grid (H+2)*(W+2) rounded up to a lane
# multiple; channels are padded to 8 sublanes.  Borders / pad channels are 0.
# --------------------------------------------------------------------------
def _to_pcf(x_nchw):
    n, c, h, w = x_nchw.shape
    assert c <= CPAD
    hp, wp = h + 2, w + 2
    x = jnp.pad(x_nchw, ((0, 0), (0, CPAD - c), (1, 1), (1, 1)))
    mp = _round_up(hp * wp, LANE)
    x = x.reshape(n, CPAD, hp * wp)
    return jnp.pad(x, ((0, 0), (0, 0), (0, mp - hp * wp))).astype(jnp.float32)


def _from_pcf(x_pcf, c, h, w):
    n = x_pcf.shape[0]
    hp, wp = h + 2, w + 2
    x = x_pcf[..., :hp * wp].reshape(n, CPAD, hp, wp)
    return x[:, :c, 1:h + 1, 1:w + 1]


def _interior_mask(h, w, mp):
    hp, wp = h + 2, w + 2
    m = jnp.zeros((hp, wp), jnp.float32).at[1:h + 1, 1:w + 1].set(1.0)
    m = m.reshape(1, hp * wp)
    m = jnp.pad(m, ((0, 0), (0, mp - hp * wp)))
    return jnp.tile(m, (CPAD, 1))


def _offsets_for_taps(n_taps):
    if n_taps == 1:
        return ((0, 0),)
    if n_taps == 9:
        return tuple((a - 1, b - 1) for a in range(3) for b in range(3))
    raise ValueError(f"unsupported tap count {n_taps}")


def _const_map(ndim):
    def _im(n):
        return (0,) * ndim
    return _im


# --------------------------------------------------------------------------
# In-kernel conv building blocks (activation lives in VMEM the whole time).
# --------------------------------------------------------------------------
def _conv_accumulate(hb, tap_fn, offsets, wp, mp, cache=None):
    """acc[o, m] = sum_t sum_i tap_fn(t)[o, i] * hb[i, m + dy*wp + dx]."""
    cache = {} if cache is None else cache
    acc = None
    for t, (dy, dx) in enumerate(offsets):
        s = dy * wp + dx
        if s in cache:
            xs = cache[s]
        elif s == 0:
            xs = hb
            cache[s] = xs
        else:
            xs = pltpu.roll(hb, _lane_shift(s, mp), axis=1)
            cache[s] = xs
        d = jnp.dot(tap_fn(t), xs, preferred_element_type=jnp.float32)
        acc = d if acc is None else acc + d
    return acc


def _epilogue(acc, scale, shift, act, mask):
    y = acc * scale + shift                  # conv bias + folded BatchNorm
    if act == "relu":
        y = jnp.maximum(y, 0.0)
    elif act == "relu_sigmoid":
        y = jax.nn.sigmoid(jnp.maximum(y, 0.0))
    elif act != "none":
        raise ValueError(act)
    return y * mask                          # keep border / tail exactly zero


# --------------------------------------------------------------------------
# Fused "stage" kernel: a static plan of convs / residual blocks / relus,
# executed entirely in VMEM, one grid step per image.
# --------------------------------------------------------------------------
def _build_plan(lead_convs, res_blocks, tail_relu):
    plan, weights = [], []
    for pc, act in lead_convs:
        plan.append(("conv", act))
        weights += [pc["taps"], pc["scale"], pc["shift"]]
    for rb in res_blocks:
        plan.append(("res_open",))
        plan.append(("relu",))
        plan.append(("conv", "relu"))
        weights += [rb["c1"]["taps"], rb["c1"]["scale"], rb["c1"]["shift"]]
        plan.append(("conv", "none"))
        weights += [rb["c2"]["taps"], rb["c2"]["scale"], rb["c2"]["shift"]]
        plan.append(("res_close",))
    if tail_relu:
        plan.append(("relu",))
    return plan, weights


def _stage_call(x_pcf, weights, plan, *, H, W, compute_dtype):
    n, _, mp = x_pcf.shape
    wp = W + 2
    mask = _interior_mask(H, W, mp)

    def body(*refs):
        x_ref, mask_ref = refs[0], refs[1]
        w_refs = refs[2:-1]
        o_ref = refs[-1]
        h = x_ref[...]
        m = mask_ref[...]
        wi = 0
        saved = None
        for op in plan:
            kind = op[0]
            if kind == "conv":
                taps_ref = w_refs[wi]
                sc = w_refs[wi + 1][...]
                sh = w_refs[wi + 2][...]
                wi += 3
                offsets = _offsets_for_taps(taps_ref.shape[0])
                acc = _conv_accumulate(h.astype(compute_dtype),
                                       lambda t, r=taps_ref: r[t],
                                       offsets, wp, mp)
                h = _epilogue(acc, sc, sh, op[1], m)
            elif kind == "res_open":
                saved = h
            elif kind == "res_close":
                h = saved + h
            elif kind == "relu":
                h = jnp.maximum(h, 0.0)
        o_ref[...] = h

    in_specs = [pl.BlockSpec((None, CPAD, mp), lambda i: (i, 0, 0)),
                pl.BlockSpec((CPAD, mp), lambda i: (0, 0))]
    in_specs += [pl.BlockSpec(w.shape, _const_map(w.ndim)) for w in weights]

    return pl.pallas_call(
        body,
        out_shape=jax.ShapeDtypeStruct((n, CPAD, mp), jnp.float32),
        grid=(n,),
        in_specs=in_specs,
        out_specs=pl.BlockSpec((None, CPAD, mp), lambda i: (i, 0, 0)),
        compiler_params=pltpu.CompilerParams(
            dimension_semantics=("parallel",)),
    )(x_pcf, mask, *weights)


# --------------------------------------------------------------------------
# Fused 4x4/stride-2 ConvTranspose2d kernel: sub-pixel (4-phase) decomposition
# (each phase is a 2x2 conv on the undilated input) + folded BN + ReLU.
# --------------------------------------------------------------------------
def _phase_call(x_pcf, packed_t1, *, H, W, compute_dtype):
    n, _, mp = x_pcf.shape
    wp = W + 2
    mask = _interior_mask(H, W, mp)

    phase_offsets = []
    for ry in (0, 1):
        dys = (-1, 0) if ry == 0 else (0, 1)
        for rx in (0, 1):
            dxs = (-1, 0) if rx == 0 else (0, 1)
            phase_offsets.append(tuple((dy, dx) for dy in dys for dx in dxs))

    taps, scale, shift = packed_t1["taps"], packed_t1["scale"], packed_t1["shift"]

    def body(x_ref, mask_ref, taps_ref, scale_ref, shift_ref, o_ref):
        hb = x_ref[...].astype(compute_dtype)
        m = mask_ref[...]
        sc = scale_ref[...]
        sh = shift_ref[...]
        cache = {}
        for p in range(4):
            acc = _conv_accumulate(hb, lambda t, p=p: taps_ref[p, t],
                                   phase_offsets[p], wp, mp, cache)
            o_ref[p] = _epilogue(acc, sc, sh, "relu", m)

    in_specs = [pl.BlockSpec((None, CPAD, mp), lambda i: (i, 0, 0)),
                pl.BlockSpec((CPAD, mp), lambda i: (0, 0)),
                pl.BlockSpec(taps.shape, _const_map(taps.ndim)),
                pl.BlockSpec(scale.shape, _const_map(scale.ndim)),
                pl.BlockSpec(shift.shape, _const_map(shift.ndim))]

    return pl.pallas_call(
        body,
        out_shape=jax.ShapeDtypeStruct((n, 4, CPAD, mp), jnp.float32),
        grid=(n,),
        in_specs=in_specs,
        out_specs=pl.BlockSpec((None, 4, CPAD, mp), lambda i: (i, 0, 0, 0)),
        compiler_params=pltpu.CompilerParams(
            dimension_semantics=("parallel",)),
    )(x_pcf, mask, taps, scale, shift)


def _interleave_phases(ph, *, H, W):
    """(N, 4, 8, Mp) phase outputs at (H, W) -> PCF at (2H, 2W)."""
    n = ph.shape[0]
    hp, wp = H + 2, W + 2
    p = ph[..., :hp * wp].reshape(n, 2, 2, CPAD, hp, wp)[:, :, :, :,
                                                         1:H + 1, 1:W + 1]
    p = p.transpose(0, 3, 4, 1, 5, 2)            # (N, C, H, ry, W, rx)
    y = p.reshape(n, CPAD, 2 * H, 2 * W)
    h2, w2 = 2 * H, 2 * W
    y = jnp.pad(y, ((0, 0), (0, 0), (1, 1), (1, 1)))
    mp2 = _round_up((h2 + 2) * (w2 + 2), LANE)
    y = y.reshape(n, CPAD, (h2 + 2) * (w2 + 2))
    return jnp.pad(y, ((0, 0), (0, 0), (0, mp2 - (h2 + 2) * (w2 + 2))))


# --------------------------------------------------------------------------
# Parameter init (deterministic), BN folding, one-time packing.
# --------------------------------------------------------------------------
def _conv_p(key, cout, cin, k):
    k1, k2 = jax.random.split(key)
    std = (2.0 / (cin * k * k)) ** 0.5
    w = std * jax.random.normal(k1, (cout, cin, k, k), jnp.float32)
    b = 0.05 * jax.random.normal(k2, (cout,), jnp.float32)
    return w, b


def _tconv_p(key, cin, cout, k):
    k1, k2 = jax.random.split(key)
    std = (2.0 / (cin * k * k)) ** 0.5
    w = std * jax.random.normal(k1, (cin, cout, k, k), jnp.float32)
    b = 0.05 * jax.random.normal(k2, (cout,), jnp.float32)
    return w, b


def _bn_p(key, c):
    k1, k2, k3, k4 = jax.random.split(key, 4)
    gamma = 1.0 + 0.1 * jax.random.normal(k1, (c,), jnp.float32)
    beta = 0.05 * jax.random.normal(k2, (c,), jnp.float32)
    mean = 0.05 * jax.random.normal(k3, (c,), jnp.float32)
    var = 0.8 + 0.4 * jax.random.uniform(k4, (c,), jnp.float32)
    return gamma, beta, mean, var, 1e-5


def fold_bn(bias, bn=None):
    """Per-channel (scale, shift) so out = conv_nobias * scale + shift."""
    if bn is None:
        return jnp.ones_like(bias), bias
    gamma, beta, mean, var, eps = bn
    s = gamma / jnp.sqrt(var + eps)
    return s, bias * s + (beta - mean * s)


def init_decoder_params(key, in_channels, out_channels, num_x2upsamples=2,
                        num_resids_upsample=2, num_resids_bottleneck=2,
                        hidden_channels=None):
    _out_ch = in_channels if hidden_channels is None else hidden_channels
    ki = iter(jax.random.split(key, 64))

    def cc(cin, cout):
        w1, b1 = _conv_p(next(ki), cout, cin, 3)
        bn1 = _bn_p(next(ki), cout)
        w2, b2 = _conv_p(next(ki), cout, cout, 3)
        return (w1, b1, bn1, w2, b2)

    def res(c):
        w1, b1 = _conv_p(next(ki), c, c, 3)
        bn1 = _bn_p(next(ki), c)
        w2, b2 = _conv_p(next(ki), c, c, 1)
        return (w1, b1, bn1, w2, b2)

    def ups(cin, cout):
        w1, b1 = _tconv_p(next(ki), cin, cout, 4)
        bn1 = _bn_p(next(ki), cout)
        w2, b2 = _tconv_p(next(ki), cout, cout, 3)
        return (w1, b1, bn1, w2, b2)

    params = {"start": cc(in_channels, _out_ch),
              "bottleneck": [res(_out_ch) for _ in range(num_resids_bottleneck)]}
    ups_list = []
    for _ in range(num_x2upsamples):
        cin = _out_ch
        _out_ch = cin // 2
        ups_list.append((ups(cin, _out_ch),
                         [res(_out_ch) for _ in range(num_resids_upsample)]))
    params["upsample"] = ups_list
    params["end"] = cc(_out_ch, out_channels)
    return params


def _pad_oi(w_oi, dtype):
    cout, cin = w_oi.shape
    z = jnp.zeros((CPAD, CPAD), dtype)
    return z.at[:cout, :cin].set(w_oi.astype(dtype))


def _pad_ch(v):
    z = jnp.zeros((CPAD, 1), jnp.float32)
    return z.at[:v.shape[0], 0].set(v.astype(jnp.float32))


def pack_decoder_params(params, compute_dtype=jnp.bfloat16):
    """Hoisted weight preprocessing: BN folding, tconv->conv flip, sub-pixel
    phase packing, channel padding and dtype cast (done once per params)."""

    def pc(w, b, bn):                                 # Conv2d, OIHW
        cout, cin, kh, kw = w.shape
        s, t = fold_bn(b, bn)
        taps = jnp.stack([_pad_oi(w[:, :, a, bb], compute_dtype)
                          for a in range(kh) for bb in range(kw)])
        return {"taps": taps, "scale": _pad_ch(s), "shift": _pad_ch(t)}

    def pt3(w_io, b, bn):                             # ConvTranspose2d 3x3 s1 p1
        w_conv = jnp.transpose(w_io[:, :, ::-1, ::-1], (1, 0, 2, 3))
        return pc(w_conv, b, bn)

    def pt4(w_io, b, bn):                             # ConvTranspose2d 4x4 s2 p1
        s, t = fold_bn(b, bn)
        phases = []
        for ry in (0, 1):
            kys = (3, 1) if ry == 0 else (2, 0)
            for rx in (0, 1):
                kxs = (3, 1) if rx == 0 else (2, 0)
                phases.append(jnp.stack(
                    [_pad_oi(w_io[:, :, ky, kx].T, compute_dtype)
                     for ky in kys for kx in kxs]))
        return {"taps": jnp.stack(phases), "scale": _pad_ch(s),
                "shift": _pad_ch(t)}

    w1, b1, bn1, w2, b2 = params["start"]
    packed = {"start": (pc(w1, b1, bn1), pc(w2, b2, None))}
    packed["bottleneck"] = [{"c1": pc(a, b, c), "c2": pc(d, e, None)}
                            for (a, b, c, d, e) in params["bottleneck"]]
    ups = []
    for (up_p, res_ps) in params["upsample"]:
        uw1, ub1, ubn1, uw2, ub2 = up_p
        ups.append({"t1": pt4(uw1, ub1, ubn1),
                    "t2": pt3(uw2, ub2, None),
                    "res": [{"c1": pc(a, b, c), "c2": pc(d, e, None)}
                            for (a, b, c, d, e) in res_ps]})
    packed["upsample"] = ups
    w1, b1, bn1, w2, b2 = params["end"]
    packed["end"] = (pc(w1, b1, bn1), pc(w2, b2, None))
    return packed


# --------------------------------------------------------------------------
# Decoder forward (Pallas): 6 fused pallas_calls for the default config.
# --------------------------------------------------------------------------
def decoder_forward(x_nchw, packed, *, out_channels,
                    compute_dtype=jnp.bfloat16):
    n, _, h, w = x_nchw.shape
    x = _to_pcf(x_nchw)

    # ChangeChannels start + bottleneck ResidualStack (one kernel).
    plan, ws = _build_plan([(packed["start"][0], "relu"),
                            (packed["start"][1], "relu")],
                           packed["bottleneck"], tail_relu=True)
    x = _stage_call(x, ws, plan, H=h, W=w, compute_dtype=compute_dtype)

    cur_h, cur_w = h, w
    for stg in packed["upsample"]:
        # tconv 4x4 / stride 2 as 4 sub-pixel phases (+ folded BN + ReLU).
        ph = _phase_call(x, stg["t1"], H=cur_h, W=cur_w,
                         compute_dtype=compute_dtype)
        x = _interleave_phases(ph, H=cur_h, W=cur_w)
        cur_h, cur_w = 2 * cur_h, 2 * cur_w
        # tconv 3x3 / stride 1 (as conv) + ReLU + ResidualStack (one kernel).
        plan, ws = _build_plan([(stg["t2"], "relu")], stg["res"],
                               tail_relu=True)
        x = _stage_call(x, ws, plan, H=cur_h, W=cur_w,
                        compute_dtype=compute_dtype)

    # ChangeChannels end + final sigmoid (one kernel).
    plan, ws = _build_plan([(packed["end"][0], "relu"),
                            (packed["end"][1], "relu_sigmoid")],
                           [], tail_relu=False)
    x = _stage_call(x, ws, plan, H=cur_h, W=cur_w,
                    compute_dtype=compute_dtype)

    return _from_pcf(x, out_channels, cur_h, cur_w)


# --------------------------------------------------------------------------
# Pure-JAX/XLA reference (same assumed block structure) for verification.
# --------------------------------------------------------------------------
def _act(y, act):
    if act == "relu":
        return jnp.maximum(y, 0.0)
    if act == "relu_sigmoid":
        return jax.nn.sigmoid(jnp.maximum(y, 0.0))
    return y


def _ref_conv(x, w, b, bn, act, pad):
    s, t = fold_bn(b, bn)
    y = jax.lax.conv_general_dilated(
        x, w, window_strides=(1, 1), padding=[(pad, pad), (pad, pad)],
        dimension_numbers=("NCHW", "OIHW", "NCHW"),
        precision=jax.lax.Precision.HIGHEST)
    y = y * s[None, :, None, None] + t[None, :, None, None]
    return _act(y, act)


def _ref_tconv(x, w_io, b, bn, act, stride, pad):
    k = w_io.shape[-1]
    w_conv = jnp.transpose(w_io[:, :, ::-1, ::-1], (1, 0, 2, 3))
    s, t = fold_bn(b, bn)
    y = jax.lax.conv_general_dilated(
        x, w_conv, window_strides=(1, 1),
        padding=[(k - 1 - pad, k - 1 - pad)] * 2,
        lhs_dilation=(stride, stride),
        dimension_numbers=("NCHW", "OIHW", "NCHW"),
        precision=jax.lax.Precision.HIGHEST)
    y = y * s[None, :, None, None] + t[None, :, None, None]
    return _act(y, act)


def reference_decoder(x, params):
    def cc(x, p, final_act):
        w1, b1, bn1, w2, b2 = p
        x = _ref_conv(x, w1, b1, bn1, "relu", 1)
        return _ref_conv(x, w2, b2, None, final_act, 1)

    def res_stack(x, plist):
        for (w1, b1, bn1, w2, b2) in plist:
            y = _ref_conv(jnp.maximum(x, 0.0), w1, b1, bn1, "relu", 1)
            y = _ref_conv(y, w2, b2, None, "none", 0)
            x = x + y
        return jnp.maximum(x, 0.0)

    x = cc(x, params["start"], "relu")
    x = res_stack(x, params["bottleneck"])
    for (up_p, res_ps) in params["upsample"]:
        w1, b1, bn1, w2, b2 = up_p
        x = _ref_tconv(x, w1, b1, bn1, "relu", 2, 1)
        x = _ref_tconv(x, w2, b2, None, "relu", 1, 1)
        x = res_stack(x, res_ps)
    x = cc(x, params["end"], "relu")
    return jax.nn.sigmoid(x)


# --------------------------------------------------------------------------
if __name__ == "__main__":
    key = jax.random.PRNGKey(0)
    kx, kp = jax.random.split(key)

    in_channels, out_channels = 8, 3
    batch, spatial = 2, 8
    x = jax.random.normal(kx, (batch, in_channels, spatial, spatial),
                          jnp.float32)

    params = init_decoder_params(kp, in_channels, out_channels,
                                 num_x2upsamples=2,
                                 num_resids_upsample=2,
                                 num_resids_bottleneck=2)

    _roll_semantics_sign()                      # resolve lane-roll direction

    y_ref = jax.block_until_ready(jax.jit(reference_decoder)(x, params))

    # f32 compute path: numerical verification of the Pallas lowering.
    packed_f32 = pack_decoder_params(params, jnp.float32)
    fwd_f32 = jax.jit(functools.partial(decoder_forward,
                                        out_channels=out_channels,
                                        compute_dtype=jnp.float32))
    y32 = jax.block_until_ready(fwd_f32(x, packed_f32))
    err32 = float(jnp.max(jnp.abs(y32 - y_ref)))

    # bf16 compute path: the performance configuration.
    packed_bf16 = pack_decoder_params(params, jnp.bfloat16)
    fwd = jax.jit(functools.partial(decoder_forward,
                                    out_channels=out_channels,
                                    compute_dtype=jnp.bfloat16))
    y = jax.block_until_ready(fwd(x, packed_bf16))
    err16 = float(jnp.max(jnp.abs(y - y_ref)))

    # 2 upsamples of x2 each: 8 -> 32 spatial; output channels = out_channels
    assert y.shape == (batch, out_channels, spatial * 4, spatial * 4), y.shape
    assert bool(jnp.all(jnp.isfinite(y)))
    assert bool(jnp.all((y >= 0.0) & (y <= 1.0)))       # sigmoid range
    assert err32 < 1e-2, f"f32 Pallas path mismatch vs reference: {err32}"
    assert err16 < 5e-2, f"bf16 Pallas path mismatch vs reference: {err16}"
    print("KERNEL_OK")
</pallas_src>

<mosaic_0001>
module attributes {stable_mosaic.version = 11 : i64} {
  func.func @_probe(%arg0: memref<8x128xf32, #tpu.memory_space<vmem>>, %arg1: memref<8x128xf32, #tpu.memory_space<vmem>>) attributes {dimension_semantics = [], scalar_prefetch = 0 : i64, scratch_operands = 0 : i64, tpu.core_type = #tpu.core_type<tc>} {
    %c0 = arith.constant 0 : index
    %c0_0 = arith.constant 0 : index
    %0 = vector.load %arg0[%c0, %c0_0] : memref<8x128xf32, #tpu.memory_space<vmem>>, vector<8x128xf32>
    %c1_i32 = arith.constant 1 : i32
    %1 = tpu.dynamic_rotate %0 by %c1_i32 dim 1 : vector<8x128xf32>, i32 -> vector<8x128xf32>
    %c0_1 = arith.constant 0 : index
    %c0_2 = arith.constant 0 : index
    %2 = vector.load %arg1[%c0_1, %c0_2] : memref<8x128xf32, #tpu.memory_space<vmem>>, vector<8x128xf32>
    tpu.vector_store %arg1[%c0_1, %c0_2], %1 {strides = array<i32>} : memref<8x128xf32, #tpu.memory_space<vmem>>, vector<8x128xf32>,
    return
  }
}

</mosaic_0001>

<bundles_post_ra>
// kernel: tpu_custom_call.1
= control target key start
LH: loop header
LB: loop body
LE: loop exit
PB: predicated region body
PF: predicated region fallthrough
CT: control target
= control target key end

     0   :  { %6 = vsyncpa [#allocation3], 0  ;;  %s128_s0 = inlined_call_operand.hbm [shape: f32[8,128], index: 0, kind: input, shape index: {}]   ;;  %s129_s1 = inlined_call_operand.hbm [shape: f32[8,128], index: 1, kind: output, shape index: {}]  }
   0x1   :  { %7 = vsyncpa [#allocation4], 0  ;;  %s91_s6 = smov [#allocation2]   ;;  %s43_s10 = scalar_lea.hbm %s128_s0, 128 }
   0x2   :  { %s14_s7 = sshll.u32 %s91_s6, 4  ;;  %p44_p0 = scmp.ne.s32.totalorder %s128_s0, %s43_s10  ;;  %s15_s7 = int_to_ptr.vmem [resolvable:$true] %s14_s7 }
   0x3   :  { %p47_p1 = scmp.lt.u32.totalorder %s43_s10, %s128_s0 }
   0x5   :  { %p49_p2 = pnand %p47_p1, %p44_p0 }
   0x7   :  { %52 = shalt.err (!%p49_p2)
}
   0x8   :  { %s53_s15 = scalar_lea.vmem %s15_s7, 128  ;;  %p58_p4 = scmp.lt.s32.totalorder %s15_s7, %s15_s7 }
   0x9   :  { %p54_p3 = scmp.ne.s32.totalorder %s15_s7, %s53_s15  ;;  %p59_p5 = scmp.lt.s32.totalorder %s53_s15, %s53_s15 }
   0xb   :  { %p60_p6 = por %p59_p5, %p58_p4 }
   0xd   :  { %p61_p7 = pnand %p60_p6, %p54_p3 }
   0xf   :  { %64 = shalt.err (!%p61_p7)
}
  0x10   :  { %17 = dma.hbm_to_vmem [thread:$0]  %s128_s0, 128, %s15_s7, [#allocation3]  }
  0x11   :  { %87 = dma.done.wait [#allocation3], 128  }
  0x12   :  { %88 = vsyncadd [#allocation3], 4294967168  ;;  %v21_v0 = vld [vmem:[#allocation2] sm:$0xff]  ;;  %s92_s18 = smov 1   ;;  %s93_s19 = smov [#allocation5]  }
  0x13   :  { %22 = vrot.lane.b32.xlu0 %v21_v0, %s92_s18  ;;  %s31_s20 = sshll.u32 %s93_s19, 4  ;;  %s32_s20 = int_to_ptr.vmem [resolvable:$true] %s31_s20 }
  0x14   :  { %s65_s21 = scalar_lea.vmem %s32_s20, 128  ;;  %p70_p9 = scmp.lt.s32.totalorder %s32_s20, %s32_s20 }
  0x15   :  { %p66_p8 = scmp.ne.s32.totalorder %s32_s20, %s65_s21  ;;  %p71_p10 = scmp.lt.s32.totalorder %s65_s21, %s65_s21 }
  0x17   :  { %p72_p11 = por %p71_p10, %p70_p9 }
  0x19   :  { %p73_p12 = pnand %p72_p11, %p66_p8 }
  0x85   :  { %v23_v1 = vpop.permute.xlu0 %22 }
  0x86   :  { %24 = vst [vmem:[#allocation5] sm:$0xff] %v23_v1 }
  0x87   :  { %76 = shalt.err (!%p73_p12)
}
  0x88   :  { %s77_s0 = scalar_lea.hbm %s129_s1, 128 }
  0x89   :  { %p78_p13 = scmp.ne.s32.totalorder %s129_s1, %s77_s0  ;;  %p81_p0 = scmp.lt.u32.totalorder %s77_s0, %s129_s1 }
  0x8b   :  { %p83_p1 = pnand %p81_p0, %p78_p13 }
  0x8d   :  { %86 = shalt.err (!%p83_p1)
}
  0x8e   :  { %34 = dma.vmem_to_hbm [thread:$0]  %s32_s20, 128, %s129_s1, [#allocation4]  }
  0x8f   :  { %89 = dma.done.wait [#allocation4], 128  }
  0x90   :  { %90 = vsyncadd [#allocation4], 4294967168 }
  0x91   :  { %38 = vsyncpa [#allocation3], 1 }
  0x92   :  { %39 = vsyncpa [#allocation4], 1 }

</bundles_post_ra>
